<compile_context>
chip_gen: v7x
topology: tpu7x:2x2x1
jax: 0.10.0
libtpu: 0.0.40
codegen_flags: <defaults>
</compile_context>

<pallas_src>
import functools

import jax
import jax.numpy as jnp
from jax.experimental import pallas as pl
from jax.experimental.pallas import tpu as pltpu


def _mtl_loss_kernel(pred_ref, logit_ref, tgt_ref, reg_out_ref, ce_out_ref, *, batch):
    """One batch tile of the fused multi-task loss.

    pred_ref   : (TB, 4) f32 VMEM  -- columns [MI, FFR_1, FFR_2, A] predictions
    logit_ref  : (TB, C) f32 VMEM  -- stenosis logits
    tgt_ref    : (TB, 5) f32 VMEM  -- target columns [MI, FFR_1, FFR_2, A, class]
    reg_out_ref: (1, 4)  f32 VMEM  -- resident accumulator -> per-column MSE means
    ce_out_ref : (1, 1)  f32 VMEM  -- resident accumulator -> mean cross-entropy
    """
    step = pl.program_id(0)
    tb = pred_ref.shape[0]

    @pl.when(step == 0)
    def _init():
        reg_out_ref[...] = jnp.zeros_like(reg_out_ref)
        ce_out_ref[...] = jnp.zeros_like(ce_out_ref)

    # Row-validity mask for the (possibly partial) last tile: ragged batches are
    # handled here instead of padding the inputs in the wrapper.
    row = jax.lax.broadcasted_iota(jnp.int32, (tb, 1), 0) + step * tb
    valid = row < batch                                            # (TB, 1) bool

    tgt = tgt_ref[...]                                             # (TB, 5)

    # ---- MI / FFR_1 / FFR_2 / A squared errors: one fused pass --------------
    diff = pred_ref[...] - tgt[:, 0:4]                             # (TB, 4)
    sq = jnp.where(valid, diff * diff, 0.0)                        # mask padded rows
    reg_out_ref[...] += jnp.sum(sq, axis=0, keepdims=True)         # (1, 4) running sums

    # ---- stenosis cross-entropy (numerically stable logsumexp) --------------
    logits = logit_ref[...]                                        # (TB, C)
    m = jnp.max(logits, axis=-1, keepdims=True)
    lse = m + jnp.log(jnp.sum(jnp.exp(logits - m), axis=-1, keepdims=True))
    label = tgt[:, 4:5].astype(jnp.int32)                          # float class id -> long
    lane = jax.lax.broadcasted_iota(jnp.int32, logits.shape, 1)
    picked = jnp.sum(jnp.where(lane == label, logits, 0.0),
                     axis=-1, keepdims=True)                       # logits[i, y_i]
    ce = jnp.where(valid, lse - picked, 0.0)                       # (TB, 1)
    ce_out_ref[...] += jnp.sum(ce, axis=0, keepdims=True)          # (1, 1) running sum

    # ---- finalize: turn running sums into batch means ------------------------
    @pl.when(step == pl.num_programs(0) - 1)
    def _finalize():
        inv_b = jnp.float32(1.0 / batch)
        reg_out_ref[...] = reg_out_ref[...] * inv_b
        ce_out_ref[...] = ce_out_ref[...] * inv_b


def abstract_mtl_forward(output, target, *, tile_b=4096):
    """Pallas equivalent of AbstractMTL(['MI','FFR','A','stenosis']).forward.

    output: tuple (mi [B,1], ffr_1 [B,1], ffr_2 [B,1], a [B,1], stenosis_logits [B,C])
    target: [B, 5] float; column 4 holds the stenosis class index (as float).
    Returns (MI_loss, FFR_loss, A_loss, stenosis_loss) as f32 scalars.
    """
    mi, ffr1, ffr2, a, logits = output
    B = target.shape[0]
    C = logits.shape[1]

    # Fuse the four single-column regression heads into one [B, 4] operand so all
    # MSE terms share a single streamed tile (mirrors the module's .float() casts).
    reg_pred = jnp.concatenate([mi, ffr1, ffr2, a], axis=1).astype(jnp.float32)
    logits = logits.astype(jnp.float32)
    tgt = target[:, :5].astype(jnp.float32)

    # Batch tiling: cdiv grid + in-kernel masking (NO full-array jnp.pad). A single
    # full-extent block is used when the batch fits in one tile.
    tile = max(8, (min(tile_b, 4096) // 8) * 8)
    if B <= tile:
        tile = B
    num_tiles = pl.cdiv(B, tile)

    cost = pl.CostEstimate(
        flops=B * (12 + 6 * C),
        transcendentals=B * (C + 1),
        bytes_accessed=B * (4 + C + 5) * 4 + 5 * 4,
    )

    reg_losses, ce_loss = pl.pallas_call(
        functools.partial(_mtl_loss_kernel, batch=B),
        out_shape=(
            jax.ShapeDtypeStruct((1, 4), jnp.float32),
            jax.ShapeDtypeStruct((1, 1), jnp.float32),
        ),
        grid_spec=pltpu.PrefetchScalarGridSpec(
            num_scalar_prefetch=0,
            grid=(num_tiles,),
            in_specs=[
                pl.BlockSpec((tile, 4), lambda i: (i, 0)),   # fused regression preds
                pl.BlockSpec((tile, C), lambda i: (i, 0)),   # stenosis logits
                pl.BlockSpec((tile, 5), lambda i: (i, 0)),   # targets
            ],
            out_specs=(
                pl.BlockSpec((1, 4), lambda i: (0, 0)),      # resident accumulators
                pl.BlockSpec((1, 1), lambda i: (0, 0)),
            ),
        ),
        compiler_params=pltpu.CompilerParams(
            dimension_semantics=("arbitrary",)),             # reduction over batch tiles
        cost_estimate=cost,
    )(reg_pred, logits, tgt)

    mi_loss = reg_losses[0, 0]
    ffr_loss = reg_losses[0, 1] + reg_losses[0, 2]   # multiple_MSE = sum of two means
    a_loss = reg_losses[0, 3]
    stenosis_loss = ce_loss[0, 0]
    # TODO(synk): self.current_losses[k] = loss.item(), get_weights()/get_regularization()
    # are host-side Python bookkeeping with no device-kernel equivalent.
    return mi_loss, ffr_loss, a_loss, stenosis_loss


def _reference(output, target):
    mi, f1, f2, a, logits = output
    t = target.astype(jnp.float32)
    mse = lambda p, y: jnp.mean((p.astype(jnp.float32) - y) ** 2)
    mi_l = mse(mi, t[:, 0:1])
    ffr_l = mse(f1, t[:, 1:2]) + mse(f2, t[:, 2:3])
    a_l = mse(a, t[:, 3:4])
    lbl = t[:, 4].astype(jnp.int32)
    lg = logits.astype(jnp.float32)
    lse = jax.nn.logsumexp(lg, axis=-1)
    picked = jnp.take_along_axis(lg, lbl[:, None], axis=1)[:, 0]
    sten_l = jnp.mean(lse - picked)
    return mi_l, ffr_l, a_l, sten_l


if __name__ == "__main__":
    def make_inputs(b, c, key):
        ks = jax.random.split(key, 7)
        mi = jax.random.normal(ks[0], (b, 1), jnp.float32)
        f1 = jax.random.normal(ks[1], (b, 1), jnp.float32)
        f2 = jax.random.normal(ks[2], (b, 1), jnp.float32)
        a = jax.random.normal(ks[3], (b, 1), jnp.float32)
        logits = jax.random.normal(ks[4], (b, c), jnp.float32)
        reg_tgt = jax.random.normal(ks[5], (b, 4), jnp.float32)
        cls = jax.random.randint(ks[6], (b, 1), 0, c).astype(jnp.float32)
        target = jnp.concatenate([reg_tgt, cls], axis=1)        # [B, 5]
        return (mi, f1, f2, a, logits), target

    # Small shapes consistent with the module: batch=16, 4 stenosis classes.
    B, C = 16, 4
    output, target = make_inputs(B, C, jax.random.PRNGKey(0))
    losses = abstract_mtl_forward(output, target)
    jax.block_until_ready(losses)
    refs = _reference(output, target)
    for got, ref in zip(losses, refs):
        assert got.shape == ()
        assert jnp.allclose(got, ref, atol=1e-5, rtol=1e-5), (got, ref)

    # Ragged multi-tile path: batch not a multiple of the tile -> cdiv grid +
    # in-kernel row masking (no padding copies).
    B2 = 37
    output2, target2 = make_inputs(B2, C, jax.random.PRNGKey(1))
    losses2 = abstract_mtl_forward(output2, target2, tile_b=16)
    jax.block_until_ready(losses2)
    refs2 = _reference(output2, target2)
    for got, ref in zip(losses2, refs2):
        assert jnp.allclose(got, ref, atol=1e-5, rtol=1e-5), (got, ref)

    print("KERNEL_OK")
</pallas_src>

<mosaic_0001>
module attributes {stable_mosaic.version = 11 : i64} {
  func.func @_mtl_loss_kernel(%arg0: i32, %arg1: memref<16x4xf32, #tpu.memory_space<vmem>>, %arg2: memref<16x4xf32, #tpu.memory_space<vmem>>, %arg3: memref<16x5xf32, #tpu.memory_space<vmem>>, %arg4: memref<1x4xf32, #tpu.memory_space<vmem>>, %arg5: memref<1x1xf32, #tpu.memory_space<vmem>>) attributes {dimension_semantics = [#tpu.dimension_semantics<arbitrary>], iteration_bounds = array<i64: 1>, scalar_prefetch = 0 : i64, scratch_operands = 0 : i64, tpu.core_type = #tpu.core_type<tc>, window_params = [{transform_indices = @transform_0, window_bounds = array<i64: 16, 4>}, {transform_indices = @transform_1, window_bounds = array<i64: 16, 4>}, {transform_indices = @transform_2, window_bounds = array<i64: 16, 5>}, {pipeline_mode = #tpu.pipeline_mode<synchronous>, transform_indices = @transform_3, window_bounds = array<i64: 1, 4>}, {pipeline_mode = #tpu.pipeline_mode<synchronous>, transform_indices = @transform_4, window_bounds = array<i64: 1, 1>}]} {
    %c0_i32 = arith.constant 0 : i32
    %0 = arith.cmpi eq, %arg0, %c0_i32 : i32
    %1 = arith.extui %0 : i1 to i32
    %c0_i32_0 = arith.constant 0 : i32
    %2 = arith.cmpi ne, %1, %c0_i32_0 : i32
    scf.if %2 {
      %cst_24 = arith.constant 0.000000e+00 : f32
      %53 = vector.broadcast %cst_24 : f32 to vector<1x4xf32>
      %c0_25 = arith.constant 0 : index
      %c0_26 = arith.constant 0 : index
      %54 = vector.load %arg4[%c0_25, %c0_26] : memref<1x4xf32, #tpu.memory_space<vmem>>, vector<1x4xf32>
      tpu.vector_store %arg4[%c0_25, %c0_26], %53 {strides = array<i32>} : memref<1x4xf32, #tpu.memory_space<vmem>>, vector<1x4xf32>,
      %cst_27 = arith.constant 0.000000e+00 : f32
      %55 = vector.broadcast %cst_27 : f32 to vector<1x1xf32>
      %c0_28 = arith.constant 0 : index
      %c0_29 = arith.constant 0 : index
      %56 = vector.load %arg5[%c0_28, %c0_29] : memref<1x1xf32, #tpu.memory_space<vmem>>, vector<1x1xf32>
      tpu.vector_store %arg5[%c0_28, %c0_29], %55 {strides = array<i32>} : memref<1x1xf32, #tpu.memory_space<vmem>>, vector<1x1xf32>,
    } else {
    }
    %3 = tpu.iota {dimensions = array<i32: 0>} : vector<16x1xi32>
    %c16_i32 = arith.constant 16 : i32
    %4 = arith.muli %arg0, %c16_i32 : i32
    %5 = vector.broadcast %4 : i32 to vector<16x1xi32>
    %6 = arith.addi %3, %5 : vector<16x1xi32>
    %c16_i32_1 = arith.constant 16 : i32
    %7 = vector.broadcast %c16_i32_1 : i32 to vector<16x1xi32>
    %8 = arith.cmpi slt, %6, %7 : vector<16x1xi32>
    %c0 = arith.constant 0 : index
    %c0_2 = arith.constant 0 : index
    %9 = vector.load %arg3[%c0, %c0_2] : memref<16x5xf32, #tpu.memory_space<vmem>>, vector<16x5xf32>
    %c0_3 = arith.constant 0 : index
    %c0_4 = arith.constant 0 : index
    %10 = vector.load %arg1[%c0_3, %c0_4] : memref<16x4xf32, #tpu.memory_space<vmem>>, vector<16x4xf32>
    %11 = vector.extract_strided_slice %9 {offsets = [0, 0], sizes = [16, 4], strides = [1, 1]} : vector<16x5xf32> to vector<16x4xf32>
    %12 = arith.subf %10, %11 : vector<16x4xf32>
    %13 = arith.mulf %12, %12 : vector<16x4xf32>
    %cst = arith.constant 0.000000e+00 : f32
    %14 = vector.shape_cast %8 : vector<16x1xi1> to vector<16x1xi1>
    %15 = vector.broadcast %14 : vector<16x1xi1> to vector<16x4xi1>
    %16 = vector.broadcast %cst : f32 to vector<16x4xf32>
    %17 = arith.select %15, %13, %16 : vector<16x4xi1>, vector<16x4xf32>
    %c0_5 = arith.constant 0 : index
    %c0_6 = arith.constant 0 : index
    %18 = vector.load %arg4[%c0_5, %c0_6] : memref<1x4xf32, #tpu.memory_space<vmem>>, vector<1x4xf32>
    %cst_7 = arith.constant dense<0.000000e+00> : vector<4xf32>
    %19 = vector.multi_reduction <add>, %17, %cst_7 [0] : vector<16x4xf32> to vector<4xf32>
    %20 = vector.shape_cast %19 : vector<4xf32> to vector<1x4xf32>
    %21 = arith.addf %18, %20 : vector<1x4xf32>
    %c0_8 = arith.constant 0 : index
    %c0_9 = arith.constant 0 : index
    %22 = vector.load %arg4[%c0_8, %c0_9] : memref<1x4xf32, #tpu.memory_space<vmem>>, vector<1x4xf32>
    tpu.vector_store %arg4[%c0_8, %c0_9], %21 {strides = array<i32>} : memref<1x4xf32, #tpu.memory_space<vmem>>, vector<1x4xf32>,
    %c0_10 = arith.constant 0 : index
    %c0_11 = arith.constant 0 : index
    %23 = vector.load %arg2[%c0_10, %c0_11] : memref<16x4xf32, #tpu.memory_space<vmem>>, vector<16x4xf32>
    %cst_12 = arith.constant dense<0xFF800000> : vector<16xf32>
    %24 = vector.multi_reduction <maximumf>, %23, %cst_12 [1] : vector<16x4xf32> to vector<16xf32>
    %25 = vector.shape_cast %24 : vector<16xf32> to vector<16x1xf32>
    %26 = vector.broadcast %25 : vector<16x1xf32> to vector<16x4xf32>
    %27 = arith.subf %23, %26 : vector<16x4xf32>
    %28 = math.exp %27 : vector<16x4xf32>
    %cst_13 = arith.constant dense<0.000000e+00> : vector<16xf32>
    %29 = vector.multi_reduction <add>, %28, %cst_13 [1] : vector<16x4xf32> to vector<16xf32>
    %30 = vector.shape_cast %29 : vector<16xf32> to vector<16x1xf32>
    %31 = math.log %30 : vector<16x1xf32>
    %32 = arith.addf %25, %31 : vector<16x1xf32>
    %33 = vector.extract_strided_slice %9 {offsets = [0, 4], sizes = [16, 1], strides = [1, 1]} : vector<16x5xf32> to vector<16x1xf32>
    %34 = arith.fptosi %33 : vector<16x1xf32> to vector<16x1xi32>
    %35 = tpu.iota {dimensions = array<i32: 1>} : vector<16x4xi32>
    %36 = vector.broadcast %34 : vector<16x1xi32> to vector<16x4xi32>
    %37 = arith.cmpi eq, %35, %36 : vector<16x4xi32>
    %cst_14 = arith.constant 0.000000e+00 : f32
    %38 = vector.broadcast %cst_14 : f32 to vector<16x4xf32>
    %39 = arith.select %37, %23, %38 : vector<16x4xi1>, vector<16x4xf32>
    %cst_15 = arith.constant dense<0.000000e+00> : vector<16xf32>
    %40 = vector.multi_reduction <add>, %39, %cst_15 [1] : vector<16x4xf32> to vector<16xf32>
    %41 = vector.shape_cast %40 : vector<16xf32> to vector<16x1xf32>
    %42 = arith.subf %32, %41 : vector<16x1xf32>
    %cst_16 = arith.constant 0.000000e+00 : f32
    %43 = vector.broadcast %cst_16 : f32 to vector<16x1xf32>
    %44 = arith.select %8, %42, %43 : vector<16x1xi1>, vector<16x1xf32>
    %c0_17 = arith.constant 0 : index
    %c0_18 = arith.constant 0 : index
    %45 = vector.load %arg5[%c0_17, %c0_18] : memref<1x1xf32, #tpu.memory_space<vmem>>, vector<1x1xf32>
    %cst_19 = arith.constant dense<0.000000e+00> : vector<1xf32>
    %46 = vector.multi_reduction <add>, %44, %cst_19 [0] : vector<16x1xf32> to vector<1xf32>
    %47 = vector.shape_cast %46 : vector<1xf32> to vector<1x1xf32>
    %48 = arith.addf %45, %47 : vector<1x1xf32>
    %c0_20 = arith.constant 0 : index
    %c0_21 = arith.constant 0 : index
    %49 = vector.load %arg5[%c0_20, %c0_21] : memref<1x1xf32, #tpu.memory_space<vmem>>, vector<1x1xf32>
    tpu.vector_store %arg5[%c0_20, %c0_21], %48 {strides = array<i32>} : memref<1x1xf32, #tpu.memory_space<vmem>>, vector<1x1xf32>,
    %c0_i32_22 = arith.constant 0 : i32
    %50 = arith.cmpi eq, %arg0, %c0_i32_22 : i32
    %51 = arith.extui %50 : i1 to i32
    %c0_i32_23 = arith.constant 0 : i32
    %52 = arith.cmpi ne, %51, %c0_i32_23 : i32
    scf.if %52 {
      %c0_24 = arith.constant 0 : index
      %c0_25 = arith.constant 0 : index
      %53 = vector.load %arg4[%c0_24, %c0_25] : memref<1x4xf32, #tpu.memory_space<vmem>>, vector<1x4xf32>
      %cst_26 = arith.constant 6.250000e-02 : f32
      %54 = vector.broadcast %cst_26 : f32 to vector<1x4xf32>
      %55 = arith.mulf %53, %54 : vector<1x4xf32>
      %c0_27 = arith.constant 0 : index
      %c0_28 = arith.constant 0 : index
      %56 = vector.load %arg4[%c0_27, %c0_28] : memref<1x4xf32, #tpu.memory_space<vmem>>, vector<1x4xf32>
      tpu.vector_store %arg4[%c0_27, %c0_28], %55 {strides = array<i32>} : memref<1x4xf32, #tpu.memory_space<vmem>>, vector<1x4xf32>,
      %c0_29 = arith.constant 0 : index
      %c0_30 = arith.constant 0 : index
      %57 = vector.load %arg5[%c0_29, %c0_30] : memref<1x1xf32, #tpu.memory_space<vmem>>, vector<1x1xf32>
      %cst_31 = arith.constant 6.250000e-02 : f32
      %58 = vector.broadcast %cst_31 : f32 to vector<1x1xf32>
      %59 = arith.mulf %57, %58 : vector<1x1xf32>
      %c0_32 = arith.constant 0 : index
      %c0_33 = arith.constant 0 : index
      %60 = vector.load %arg5[%c0_32, %c0_33] : memref<1x1xf32, #tpu.memory_space<vmem>>, vector<1x1xf32>
      tpu.vector_store %arg5[%c0_32, %c0_33], %59 {strides = array<i32>} : memref<1x1xf32, #tpu.memory_space<vmem>>, vector<1x1xf32>,
    } else {
    }
    return
  }
  func.func @transform_0(%arg0: i32) -> (i32, i32) {
    %c0_i32 = arith.constant 0 : i32
    %c0_i32_0 = arith.constant 0 : i32
    return %arg0, %c0_i32 : i32, i32
  }
  func.func @transform_1(%arg0: i32) -> (i32, i32) {
    %c0_i32 = arith.constant 0 : i32
    %c0_i32_0 = arith.constant 0 : i32
    return %arg0, %c0_i32 : i32, i32
  }
  func.func @transform_2(%arg0: i32) -> (i32, i32) {
    %c0_i32 = arith.constant 0 : i32
    %c0_i32_0 = arith.constant 0 : i32
    return %arg0, %c0_i32 : i32, i32
  }
  func.func @transform_3(%arg0: i32) -> (i32, i32) {
    %c0_i32 = arith.constant 0 : i32
    %c0_i32_0 = arith.constant 0 : i32
    %c0_i32_1 = arith.constant 0 : i32
    return %c0_i32, %c0_i32_0 : i32, i32
  }
  func.func @transform_4(%arg0: i32) -> (i32, i32) {
    %c0_i32 = arith.constant 0 : i32
    %c0_i32_0 = arith.constant 0 : i32
    %c0_i32_1 = arith.constant 0 : i32
    return %c0_i32, %c0_i32_0 : i32, i32
  }
}

</mosaic_0001>

<bundles_post_ra>
// kernel: tpu_custom_call.1
= control target key start
LH: loop header
LB: loop body
LE: loop exit
PB: predicated region body
PF: predicated region fallthrough
CT: control target
= control target key end

     0   :  { %10 = vsyncpa [#allocation3], 0  ;;  %vm50_vm0 = vcmask 31744   ;;  %v227_v4 = vmov 4   ;;  %s320_s0 = inlined_call_operand.vmem [shape: f32[16,4], index: 0, kind: input, shape index: {}]   ;;  %s321_s1 = inlined_call_operand.vmem [shape: f32[16,4], index: 1, kind: input, shape index: {}]   ;;  %s322_s2 = inlined_call_operand.vmem [shape: f32[16,5], index: 2, kind: input, shape index: {}]   ;;  %s323_s3 = inlined_call_operand.hbm [shape: f32[1,4], index: 3, kind: output, shape index: {0}]   ;;  %s324_s4 = inlined_call_operand.hbm [shape: f32[1,1], index: 4, kind: output, shape index: {1}]  }
   0x1   :  { %v63_v0 = vld [vmem:[%s321_s1] sm:$0xff]  ;;  %v64_v1 = vld [vmem:[%s321_s1 + $0x8] sm:$0xff]  ;;  %169 = vset.pattern.permute.xlu1 %v227_v4  ;;  %170 = vset.pattern.permute.xlu0 %v227_v4 }
   0x2   :  { %v35_v2 = vld [vmem:[%s322_s2] sm:$0xff]  ;;  %v65_v3 = vsel %vm50_vm0, %v63_v0, -inf  ;;  %v36_v7 = vld [vmem:[%s322_s2 + $0x8] sm:$0xff] }
   0x3   :  { %v37_v5 = vld [vmem:[%s320_s0] sm:$0xff]  ;;  %v161_v6 = vtrunc.f32 %v35_v2  ;;  %v38_v8 = vld [vmem:[%s320_s0 + $0x8] sm:$0xff]  ;;  %66 = vmax.xlane.f32.xlu0 %v65_v3  ;;  %v163_v11 = vtrunc.f32 %v36_v7 }
   0x4   :  { %v39_v9 = vsub.f32 %v37_v5, %v35_v2  ;;  %v40_v10 = vsub.f32 %v38_v8, %v36_v7 }
   0x5   :  { %11 = vsyncpa [#allocation5], 0  ;;  %v68_v12 = vsel %vm50_vm0, %v64_v1, -inf  ;;  %v162_v13 = vcvt.f32.s32 %v161_v6  ;;  %v164_v16 = vcvt.f32.s32 %v163_v11  ;;  %v91_v24 = vlaneseq  ;;  %s229_s0 = smov [#allocation2]  }
   0x6   :  { %v41_v14 = vmul.f32 %v39_v9, %v39_v9  ;;  %v42_v15 = vmul.f32 %v40_v10, %v40_v10  ;;  %vm22_vm3 = vcmask 24576   ;;  %vm24_vm4 = vcmask 0   ;;  %s139_s1 = sshll.u32 %s229_s0, 4  ;;  %s140_s1 = int_to_ptr.vmem [resolvable:$true] %s139_s1 }
   0x7   :  { %94 = vperm.xlu1 %169, %v162_v13   ;;  %69 = vmax.xlane.f32.xlu0 %v68_v12  ;;  %v92_v28 = vand.u32 127, %v91_v24  ;;  %v228_v41 = vmov 0.0   ;;  %s179_s2 = scalar_lea.vmem %s140_s1, 16  ;;  %s183_s27 = scalar_lea.vmem %s140_s1, 32 }
   0x8   :  { %v51_v17 = vsel %vm50_vm0, %v41_v14, 0.0  ;;  %v52_v18 = vsel %vm50_vm0, %v42_v15, 0.0  ;;  %23 = vst.msk [vmem:[#allocation2] sm:$0x1] %vm22_vm3, %v228_v41  ;;  %p180_p0 = scmp.ne.s32.totalorder %s140_s1, %s179_s2  ;;  %p184_p1 = scmp.lt.s32.totalorder %s140_s1, %s140_s1 }
   0x9   :  { %v53_v19 = vadd.f32 %v52_v18, %v51_v17  ;;  %25 = vst.msk [vmem:[#allocation4] sm:$0x1] %vm24_vm4, %v228_v41  ;;  %p185_p2 = scmp.lt.s32.totalorder %s183_s27, %s179_s2 }
   0xb   :  { %97 = vperm.xlu1 %169, %v164_v16   ;;  %v54_v38 = vrot.slane %v53_v19, 4  ;;  %p186_p3 = por %p185_p2, %p184_p1 }
   0xd   :  { %v55_v39 = vadd.f32 %v54_v38, %v53_v19  ;;  %p187_p4 = pnand %p186_p3, %p180_p0 }
   0xf   :  { %v56_v40 = vrot.slane %v55_v39, 2  ;;  %v49_v45 = vld [vmem:[#allocation2] sm:$0x1] }
  0x11   :  { %v57_v42 = vadd.f32 %v56_v40, %v55_v39 }
  0x13   :  { %v58_v43 = vrot.slane %v57_v42, 1 }
  0x15   :  { %v59_v44 = vadd.f32 %v58_v43, %v57_v42 }
  0x17   :  { %v60_v46 = vadd.f32 %v59_v44, %v49_v45 }
  0x19   :  { %62 = vst.msk [vmem:[#allocation2] sm:$0x1] %vm22_vm3, %v60_v46 }
  0x20   :  { %v127_v47 = vld [vmem:[#allocation2] sm:$0x1] }
  0x21   :  { %v128_v48 = vmul.f32 0.0625, %v127_v47 }
  0x23   :  { %129 = vst.msk [vmem:[#allocation2] sm:$0x1] %vm22_vm3, %v128_v48 }
  0x86   :  { %v95_v27 = vpop.permute.xlu1 %94 }
  0x87   :  { %vm99_vm1 = vcmp.eq.s32.totalorder %v92_v28, %v95_v27 }
  0x88   :  { %v101_v31 = vsel %vm99_vm1, %v63_v0, 0.0 }
  0x89   :  { %v103_v33 = vsel %vm50_vm0, %v101_v31, 0.0 }
  0x8a   :  { %v98_v29 = vpop.permute.xlu1 %97 }
  0x8b   :  { %vm100_vm2 = vcmp.eq.s32.totalorder %v92_v28, %v98_v29 }
  0x8c   :  { %v102_v35 = vsel %vm100_vm2, %v64_v1, 0.0 }
  0x8d   :  { %v106_v37 = vsel %vm50_vm0, %v102_v35, 0.0 }
  0x90   :  { %v278_v20 = vpop.xlane.xlu0 %66 }
  0x91   :  { %v71_v21 = vsub.f32 %v63_v0, %v278_v20 }
  0x93   :  { %v73_v22 = vmul.f32 1.442695, %v71_v21 }
  0x94   :  { %v281_v23 = vpop.xlane.xlu0 %69 }
  0x95   :  { %171 = vpow2.f32 %v73_v22  ;;  %v72_v25 = vsub.f32 %v64_v1, %v281_v23 }
  0x97   :  { %v75_v26 = vmul.f32 1.442695, %v72_v25 }
  0x99   :  { %173 = vpow2.f32 %v75_v26 }
  0x9f   :  { %v172_v30 = vpop.eup %171 }
  0xa0   :  { %v77_v32 = vsel %vm50_vm0, %v172_v30, 0.0 }
  0xa1   :  { %78 = vadd.xlane.f32.xlu0 %v77_v32 }
  0xa3   :  { %v174_v34 = vpop.eup %173 }
  0xa4   :  { %v80_v36 = vsel %vm50_vm0, %v174_v34, 0.0 }
  0xa5   :  { %81 = vadd.xlane.f32.xlu1 %v80_v36  ;;  %104 = vadd.xlane.f32.xlu0 %v103_v33 }
  0xa9   :  { %107 = vadd.xlane.f32.xlu0 %v106_v37 }
  0xaa   :  { %190 = shalt.err (!%p187_p4)
}
  0xab   :  { %s191_s30 = scalar_lea.hbm %s323_s3, 16 }
  0xac   :  { %p192_p5 = scmp.ne.s32.totalorder %s323_s3, %s191_s30  ;;  %p195_p6 = scmp.lt.u32.totalorder %s191_s30, %s323_s3 }
  0xae   :  { %p197_p7 = pnand %p195_p6, %p192_p5 }
  0xb0   :  { %200 = shalt.err (!%p197_p7)
}
  0xb1   :  { %142 = dma.vmem_to_hbm [thread:$0]  %s140_s1, 16, %s323_s3, [#allocation3]   ;;  %v113_v3 = vld [vmem:[#allocation4] sm:$0x1] }
  0xb2   :  { %s230_s3 = smov [#allocation4]  }
  0xb3   :  { %s149_s11 = sshll.u32 %s230_s3, 4  ;;  %s150_s11 = int_to_ptr.vmem [resolvable:$true] %s149_s11 }
  0xb4   :  { %s201_s12 = scalar_lea.vmem %s150_s11, 16  ;;  %s205_s13 = scalar_lea.vmem %s150_s11, 32 }
  0xb5   :  { %p202_p8 = scmp.ne.s32.totalorder %s150_s11, %s201_s12  ;;  %p206_p9 = scmp.lt.s32.totalorder %s150_s11, %s150_s11 }
  0xb6   :  { %p207_p10 = scmp.lt.s32.totalorder %s205_s13, %s201_s12 }
  0xb8   :  { %p208_p11 = por %p207_p10, %p206_p9 }
  0xba   :  { %p209_p12 = pnand %p208_p11, %p202_p8 }
 0x12e   :  { %v79_v49 = vpop.xlane.xlu0 %78 }
 0x12f   :  { %175 = vlog2.f32 %v79_v49 }
 0x132   :  { %v82_v50 = vpop.xlane.xlu1 %81  ;;  %v105_v53 = vpop.xlane.xlu0 %104 }
 0x133   :  { %177 = vlog2.f32 %v82_v50 }
 0x136   :  { %v108_v58 = vpop.xlane.xlu0 %107 }
 0x139   :  { %v176_v51 = vpop.eup %175 }
 0x13a   :  { %v84_v52 = vmul.f32 0.6931472, %v176_v51 }
 0x13c   :  { %v87_v56 = vadd.f32 %v84_v52, %v278_v20 }
 0x13d   :  { %v178_v54 = vpop.eup %177 }
 0x13e   :  { %v86_v55 = vmul.f32 0.6931472, %v178_v54  ;;  %v109_v59 = vsub.f32 %v87_v56, %v105_v53 }
 0x140   :  { %v88_v57 = vadd.f32 %v86_v55, %v281_v23 }
 0x142   :  { %v110_v60 = vsub.f32 %v88_v57, %v108_v58 }
 0x144   :  { %v114_v61 = vadd.f32 %v110_v60, %v109_v59 }
 0x146   :  { %v115_v62 = vrot.slane %v114_v61, 4 }
 0x148   :  { %v116_v63 = vadd.f32 %v115_v62, %v114_v61 }
 0x14a   :  { %v117_v0 = vrot.slane %v116_v63, 2 }
 0x14c   :  { %v118_v1 = vadd.f32 %v117_v0, %v116_v63 }
 0x14e   :  { %v119_v2 = vrot.slane %v118_v1, 1 }
 0x150   :  { %v120_v4 = vadd.f32 %v119_v2, %v118_v1 }
 0x152   :  { %v121_v5 = vadd.f32 %v120_v4, %v113_v3 }
 0x154   :  { %123 = vst.msk [vmem:[#allocation4] sm:$0x1] %vm24_vm4, %v121_v5 }
 0x15b   :  { %v130_v6 = vld [vmem:[#allocation4] sm:$0x1] }
 0x15c   :  { %v131_v7 = vmul.f32 0.0625, %v130_v6 }
 0x15e   :  { %132 = vst.msk [vmem:[#allocation4] sm:$0x1] %vm24_vm4, %v131_v7 }
 0x15f   :  { %212 = shalt.err (!%p209_p12)
}
 0x160   :  { %s213_s16 = scalar_lea.hbm %s324_s4, 16 }
 0x161   :  { %p214_p13 = scmp.ne.s32.totalorder %s324_s4, %s213_s16  ;;  %p217_p0 = scmp.lt.u32.totalorder %s213_s16, %s324_s4 }
 0x163   :  { %p219_p1 = pnand %p217_p0, %p214_p13 }
 0x165   :  { %222 = shalt.err (!%p219_p1)
}
 0x166   :  { %152 = dma.vmem_to_hbm [thread:$0]  %s150_s11, 16, %s324_s4, [#allocation5]  }
 0x167   :  { %223 = dma.done.wait [#allocation3], 16  }
 0x168   :  { %224 = vsyncadd [#allocation3], 4294967280 }
 0x169   :  { %225 = dma.done.wait [#allocation5], 16  }
 0x16a   :  { %226 = vsyncadd [#allocation5], 4294967280 }
 0x16b   :  { %159 = vsyncpa [#allocation3], 1 }
 0x16c   :  { %160 = vsyncpa [#allocation5], 1 }

</bundles_post_ra>
